<compile_context>
chip_gen: v6e
topology: v6e:2x2x1
jax: 0.10.0
libtpu: 0.0.40
codegen_flags: <defaults>
</compile_context>

<pallas_src>
import functools

import jax
import jax.numpy as jnp
from jax.experimental import pallas as pl
from jax.experimental.pallas import tpu as pltpu

LANES = 128
MAX_BLOCK_ROWS = 2048   # 2048 x 128 x 4 B = 1 MiB per f32 buffer per block


def _pwl_kernel(w_ref, x_ref, o_ref, *, n):
    """w_ref: SMEM (n+1,) f32 normalized weights.
    x_ref / o_ref: VMEM (block_rows, 128) tiles in the caller's dtype."""
    y = jnp.float32(n) * x_ref[...].astype(jnp.float32)
    # Knot 0 always saturates on the [0, 1] domain: clamp(y + 1, 0, 1) == 1.
    acc = jnp.zeros_like(y) + w_ref[0]
    # Unrolled over the remaining n knots: sub + max + min + mul + add per knot.
    for k in range(1, n + 1):
        seg = jnp.clip(y - jnp.float32(k - 1), 0.0, 1.0)
        acc = acc + w_ref[k] * seg
    o_ref[...] = acc.astype(o_ref.dtype)


def piecewise_lin(x, weight, n):
    """JAX wrapper: normalize the (n+1,) parameter, flatten x to a lane-dense
    (rows, 128) slab, and run the elementwise Pallas kernel on large blocks."""
    # Parameter normalization: tiny vector, plain JAX glue.
    w = jnp.abs(weight.astype(jnp.float32))
    w = w / jnp.sum(w)

    orig_shape = x.shape
    total = int(x.size)

    rows = -(-total // LANES)                                   # ceil-div
    block_rows = rows if rows <= MAX_BLOCK_ROWS else MAX_BLOCK_ROWS
    num_blocks = -(-rows // block_rows)
    padded_total = num_blocks * block_rows * LANES

    flat = x.reshape(-1)
    if padded_total != total:            # pad only when truly needed
        flat = jnp.pad(flat, (0, padded_total - total))
    x2 = flat.reshape(num_blocks * block_rows, LANES)

    out2 = pl.pallas_call(
        functools.partial(_pwl_kernel, n=n),
        out_shape=jax.ShapeDtypeStruct(x2.shape, x.dtype),      # native dtype I/O
        grid=(num_blocks,),
        in_specs=[
            pl.BlockSpec(memory_space=pltpu.SMEM),              # normalized weights
            pl.BlockSpec((block_rows, LANES), lambda i: (i, 0)),
        ],
        out_specs=pl.BlockSpec((block_rows, LANES), lambda i: (i, 0)),
        compiler_params=pltpu.CompilerParams(
            dimension_semantics=("parallel",)),                 # megacore sharding
    )(w, x2)

    out = out2.reshape(-1)
    if padded_total != total:            # slice the tail only when padded
        out = out[:total]
    return out.reshape(orig_shape)


def piecewise_lin_ref(x, weight, n):
    """Pure-JAX reference matching the PyTorch forward (gather form)."""
    w = jnp.abs(weight.astype(jnp.float32))
    w = w / jnp.sum(w)
    csum = jnp.cumsum(w)
    y = n * x.astype(jnp.float32)
    y_trunc = jnp.trunc(y)
    f = y - y_trunc
    idx = y_trunc.astype(jnp.int32)
    out = csum[jnp.minimum(idx, n)] + f * w[jnp.minimum(idx + 1, n)]
    return out.astype(x.dtype)


if __name__ == "__main__":
    n = 8
    key = jax.random.PRNGKey(0)
    k_x, k_w = jax.random.split(key)

    # Input in [0, 1) (the module's intended domain), NCHW layout.
    x = jax.random.uniform(k_x, (2, 4, 16, 16), dtype=jnp.float32)

    # Parameter: shape (n+1,) as in __init__ (ones with weight[0] = 0),
    # deterministically perturbed so the mapping is non-trivial.
    weight = jax.random.uniform(k_w, (n + 1,), minval=0.2, maxval=1.5)
    weight = weight.at[0].set(0.0)

    out = jax.block_until_ready(piecewise_lin(x, weight, n))

    ref = piecewise_lin_ref(x, weight, n)
    assert out.shape == x.shape and out.dtype == x.dtype
    assert jnp.allclose(out, ref, atol=1e-6, rtol=1e-6), "mismatch vs reference"

    print("KERNEL_OK")
</pallas_src>

<mosaic_0001>
module attributes {stable_mosaic.version = 11 : i64} {
  func.func @_pwl_kernel(%arg0: i32, %arg1: memref<9xf32, #tpu.memory_space<smem>>, %arg2: memref<16x128xf32, #tpu.memory_space<vmem>>, %arg3: memref<16x128xf32, #tpu.memory_space<vmem>>) attributes {dimension_semantics = [#tpu.dimension_semantics<parallel>], iteration_bounds = array<i64: 1>, scalar_prefetch = 0 : i64, scratch_operands = 0 : i64, tpu.core_type = #tpu.core_type<tc>, window_params = [{transform_indices = @transform_0, window_bounds = array<i64: 9>}, {transform_indices = @transform_1, window_bounds = array<i64: 16, 128>}, {transform_indices = @transform_2, window_bounds = array<i64: 16, 128>}]} {
    %c0 = arith.constant 0 : index
    %c0_0 = arith.constant 0 : index
    %0 = vector.load %arg2[%c0, %c0_0] : memref<16x128xf32, #tpu.memory_space<vmem>>, vector<16x128xf32>
    %cst = arith.constant 8.000000e+00 : f32
    %1 = vector.broadcast %cst : f32 to vector<16x128xf32>
    %2 = arith.mulf %1, %0 : vector<16x128xf32>
    %cst_1 = arith.constant 0.000000e+00 : f32
    %3 = vector.broadcast %cst_1 : f32 to vector<16x128xf32>
    %c0_2 = arith.constant 0 : index
    %4 = memref.load %arg1[%c0_2] : memref<9xf32, #tpu.memory_space<smem>>
    %5 = vector.broadcast %4 : f32 to vector<16x128xf32>
    %6 = arith.addf %3, %5 : vector<16x128xf32>
    %cst_3 = arith.constant 0.000000e+00 : f32
    %7 = vector.broadcast %cst_3 : f32 to vector<16x128xf32>
    %8 = arith.subf %2, %7 : vector<16x128xf32>
    %cst_4 = arith.constant 0.000000e+00 : f32
    %cst_5 = arith.constant 1.000000e+00 : f32
    %9 = vector.broadcast %cst_4 : f32 to vector<16x128xf32>
    %10 = arith.maximumf %9, %8 : vector<16x128xf32>
    %11 = vector.broadcast %cst_5 : f32 to vector<16x128xf32>
    %12 = arith.minimumf %11, %10 : vector<16x128xf32>
    %c1 = arith.constant 1 : index
    %13 = memref.load %arg1[%c1] : memref<9xf32, #tpu.memory_space<smem>>
    %14 = vector.broadcast %13 : f32 to vector<16x128xf32>
    %15 = arith.mulf %14, %12 : vector<16x128xf32>
    %16 = arith.addf %6, %15 : vector<16x128xf32>
    %cst_6 = arith.constant 1.000000e+00 : f32
    %17 = vector.broadcast %cst_6 : f32 to vector<16x128xf32>
    %18 = arith.subf %2, %17 : vector<16x128xf32>
    %cst_7 = arith.constant 0.000000e+00 : f32
    %cst_8 = arith.constant 1.000000e+00 : f32
    %19 = vector.broadcast %cst_7 : f32 to vector<16x128xf32>
    %20 = arith.maximumf %19, %18 : vector<16x128xf32>
    %21 = vector.broadcast %cst_8 : f32 to vector<16x128xf32>
    %22 = arith.minimumf %21, %20 : vector<16x128xf32>
    %c2 = arith.constant 2 : index
    %23 = memref.load %arg1[%c2] : memref<9xf32, #tpu.memory_space<smem>>
    %24 = vector.broadcast %23 : f32 to vector<16x128xf32>
    %25 = arith.mulf %24, %22 : vector<16x128xf32>
    %26 = arith.addf %16, %25 : vector<16x128xf32>
    %cst_9 = arith.constant 2.000000e+00 : f32
    %27 = vector.broadcast %cst_9 : f32 to vector<16x128xf32>
    %28 = arith.subf %2, %27 : vector<16x128xf32>
    %cst_10 = arith.constant 0.000000e+00 : f32
    %cst_11 = arith.constant 1.000000e+00 : f32
    %29 = vector.broadcast %cst_10 : f32 to vector<16x128xf32>
    %30 = arith.maximumf %29, %28 : vector<16x128xf32>
    %31 = vector.broadcast %cst_11 : f32 to vector<16x128xf32>
    %32 = arith.minimumf %31, %30 : vector<16x128xf32>
    %c3 = arith.constant 3 : index
    %33 = memref.load %arg1[%c3] : memref<9xf32, #tpu.memory_space<smem>>
    %34 = vector.broadcast %33 : f32 to vector<16x128xf32>
    %35 = arith.mulf %34, %32 : vector<16x128xf32>
    %36 = arith.addf %26, %35 : vector<16x128xf32>
    %cst_12 = arith.constant 3.000000e+00 : f32
    %37 = vector.broadcast %cst_12 : f32 to vector<16x128xf32>
    %38 = arith.subf %2, %37 : vector<16x128xf32>
    %cst_13 = arith.constant 0.000000e+00 : f32
    %cst_14 = arith.constant 1.000000e+00 : f32
    %39 = vector.broadcast %cst_13 : f32 to vector<16x128xf32>
    %40 = arith.maximumf %39, %38 : vector<16x128xf32>
    %41 = vector.broadcast %cst_14 : f32 to vector<16x128xf32>
    %42 = arith.minimumf %41, %40 : vector<16x128xf32>
    %c4 = arith.constant 4 : index
    %43 = memref.load %arg1[%c4] : memref<9xf32, #tpu.memory_space<smem>>
    %44 = vector.broadcast %43 : f32 to vector<16x128xf32>
    %45 = arith.mulf %44, %42 : vector<16x128xf32>
    %46 = arith.addf %36, %45 : vector<16x128xf32>
    %cst_15 = arith.constant 4.000000e+00 : f32
    %47 = vector.broadcast %cst_15 : f32 to vector<16x128xf32>
    %48 = arith.subf %2, %47 : vector<16x128xf32>
    %cst_16 = arith.constant 0.000000e+00 : f32
    %cst_17 = arith.constant 1.000000e+00 : f32
    %49 = vector.broadcast %cst_16 : f32 to vector<16x128xf32>
    %50 = arith.maximumf %49, %48 : vector<16x128xf32>
    %51 = vector.broadcast %cst_17 : f32 to vector<16x128xf32>
    %52 = arith.minimumf %51, %50 : vector<16x128xf32>
    %c5 = arith.constant 5 : index
    %53 = memref.load %arg1[%c5] : memref<9xf32, #tpu.memory_space<smem>>
    %54 = vector.broadcast %53 : f32 to vector<16x128xf32>
    %55 = arith.mulf %54, %52 : vector<16x128xf32>
    %56 = arith.addf %46, %55 : vector<16x128xf32>
    %cst_18 = arith.constant 5.000000e+00 : f32
    %57 = vector.broadcast %cst_18 : f32 to vector<16x128xf32>
    %58 = arith.subf %2, %57 : vector<16x128xf32>
    %cst_19 = arith.constant 0.000000e+00 : f32
    %cst_20 = arith.constant 1.000000e+00 : f32
    %59 = vector.broadcast %cst_19 : f32 to vector<16x128xf32>
    %60 = arith.maximumf %59, %58 : vector<16x128xf32>
    %61 = vector.broadcast %cst_20 : f32 to vector<16x128xf32>
    %62 = arith.minimumf %61, %60 : vector<16x128xf32>
    %c6 = arith.constant 6 : index
    %63 = memref.load %arg1[%c6] : memref<9xf32, #tpu.memory_space<smem>>
    %64 = vector.broadcast %63 : f32 to vector<16x128xf32>
    %65 = arith.mulf %64, %62 : vector<16x128xf32>
    %66 = arith.addf %56, %65 : vector<16x128xf32>
    %cst_21 = arith.constant 6.000000e+00 : f32
    %67 = vector.broadcast %cst_21 : f32 to vector<16x128xf32>
    %68 = arith.subf %2, %67 : vector<16x128xf32>
    %cst_22 = arith.constant 0.000000e+00 : f32
    %cst_23 = arith.constant 1.000000e+00 : f32
    %69 = vector.broadcast %cst_22 : f32 to vector<16x128xf32>
    %70 = arith.maximumf %69, %68 : vector<16x128xf32>
    %71 = vector.broadcast %cst_23 : f32 to vector<16x128xf32>
    %72 = arith.minimumf %71, %70 : vector<16x128xf32>
    %c7 = arith.constant 7 : index
    %73 = memref.load %arg1[%c7] : memref<9xf32, #tpu.memory_space<smem>>
    %74 = vector.broadcast %73 : f32 to vector<16x128xf32>
    %75 = arith.mulf %74, %72 : vector<16x128xf32>
    %76 = arith.addf %66, %75 : vector<16x128xf32>
    %cst_24 = arith.constant 7.000000e+00 : f32
    %77 = vector.broadcast %cst_24 : f32 to vector<16x128xf32>
    %78 = arith.subf %2, %77 : vector<16x128xf32>
    %cst_25 = arith.constant 0.000000e+00 : f32
    %cst_26 = arith.constant 1.000000e+00 : f32
    %79 = vector.broadcast %cst_25 : f32 to vector<16x128xf32>
    %80 = arith.maximumf %79, %78 : vector<16x128xf32>
    %81 = vector.broadcast %cst_26 : f32 to vector<16x128xf32>
    %82 = arith.minimumf %81, %80 : vector<16x128xf32>
    %c8 = arith.constant 8 : index
    %83 = memref.load %arg1[%c8] : memref<9xf32, #tpu.memory_space<smem>>
    %84 = vector.broadcast %83 : f32 to vector<16x128xf32>
    %85 = arith.mulf %84, %82 : vector<16x128xf32>
    %86 = arith.addf %76, %85 : vector<16x128xf32>
    %c0_27 = arith.constant 0 : index
    %c0_28 = arith.constant 0 : index
    %87 = vector.load %arg3[%c0_27, %c0_28] : memref<16x128xf32, #tpu.memory_space<vmem>>, vector<16x128xf32>
    tpu.vector_store %arg3[%c0_27, %c0_28], %86 {strides = array<i32>} : memref<16x128xf32, #tpu.memory_space<vmem>>, vector<16x128xf32>,
    return
  }
  func.func @transform_0(%arg0: i32) -> i32 {
    %c0_i32 = arith.constant 0 : i32
    %c0_i32_0 = arith.constant 0 : i32
    return %c0_i32 : i32
  }
  func.func @transform_1(%arg0: i32) -> (i32, i32) {
    %c0_i32 = arith.constant 0 : i32
    %c0_i32_0 = arith.constant 0 : i32
    return %arg0, %c0_i32 : i32, i32
  }
  func.func @transform_2(%arg0: i32) -> (i32, i32) {
    %c0_i32 = arith.constant 0 : i32
    %c0_i32_0 = arith.constant 0 : i32
    return %arg0, %c0_i32 : i32, i32
  }
}

</mosaic_0001>

<bundles_post_ra>
// kernel: tpu_custom_call.1
= control target key start
LH: loop header
LB: loop body
LE: loop exit
PB: predicated region body
PF: predicated region fallthrough
CT: control target
= control target key end

     0   :  { %7 = vsyncpa [#allocation5], 0  ;;  %s311_s0 = inlined_call_operand.hbm [shape: f32[9], index: 0, kind: input, shape index: {}]   ;;  %s312_s1 = inlined_call_operand.hbm [shape: f32[16,128], index: 1, kind: input, shape index: {}]   ;;  %s313_s2 = inlined_call_operand.hbm [shape: f32[16,128], index: 2, kind: output, shape index: {}]  }
   0x1   :  { %8 = vsyncpa [#allocation3], 0 }
   0x2   :  { %9 = vsyncpa [#allocation4], 0  ;;  %s239_s9 = smov [#allocation2]   ;;  %s240_s12 = smov [#allocation6]  }
   0x3   :  { %17 = dma.hbm_to_smem %s311_s0, 16, %s239_s9, [#allocation5]  }
   0x4   :  { %s23_s13 = sshll.u32 %s240_s12, 4  ;;  %s24_s13 = int_to_ptr.vmem [resolvable:$true] %s23_s13 }
   0x5   :  { %s201_s14 = scalar_lea.vmem %s24_s13, 256  ;;  %p206_p1 = scmp.lt.s32.totalorder %s24_s13, %s24_s13 }
   0x6   :  { %p202_p0 = scmp.ne.s32.totalorder %s24_s13, %s201_s14  ;;  %p207_p2 = scmp.lt.s32.totalorder %s201_s14, %s201_s14 }
   0x8   :  { %p208_p3 = por %p207_p2, %p206_p1 }
   0xa   :  { %p209_p4 = pnand %p208_p3, %p202_p0 }
   0xc   :  { %212 = shalt.err (!%p209_p4)
}
   0xd   :  { %s241_s15 = smov 128   ;;  %s242_s16 = smov 8  }
   0xe   :  { %29 = dma.hbm_to_vmem [thread:$0]  %s312_s1, 256, %s24_s13, [#allocation3], %s241_s15, %s241_s15, %s242_s16  }
   0xf   :  { %233 = dma.done.wait [#allocation5], 16  }
  0x10   :  { %234 = vsyncadd [#allocation5], 4294967280 }
  0x11   :  { %235 = dma.done.wait [#allocation3], 256  }
  0x12   :  { %236 = vsyncadd [#allocation3], 4294967040 }
  0x13   :  { %36 = sfence }
  0x14   :  { %v37_v0 = vld [vmem:[#allocation6] sm:$0xff]  ;;  %s268_s0 = sld [smem:[#allocation2]]  ;;  %v38_v1 = vld [vmem:[#allocation6 + $0x8] sm:$0xff]  ;;  %s243_s26 = smov [#allocation7]  }
  0x15   :  { %v39_v2 = vmul.f32 8.0, %v37_v0  ;;  %s270_s19 = sld [smem:[#allocation2 + $0x1]]  ;;  %v274_v3 = vmul.f32 8.0, %v38_v1  ;;  %s145_s27 = sshll.u32 %s243_s26, 4  ;;  %s146_s27 = int_to_ptr.vmem [resolvable:$true] %s145_s27 }
  0x16   :  { %s272_s20 = sld [smem:[#allocation2 + $0x2]]  ;;  %s213_s28 = scalar_lea.vmem %s146_s27, 256 }
  0x17   :  { %v44_v4 = vmax.f32 %v39_v2, 0.0  ;;  %v159_v5 = vadd.f32 -1.0, %v39_v2  ;;  %v162_v6 = vadd.f32 -2.0, %v39_v2  ;;  %s276_s1 = sld [smem:[#allocation2 + $0x3]]  ;;  %v165_v7 = vadd.f32 -3.0, %v39_v2  ;;  %p214_p5 = scmp.ne.s32.totalorder %s146_s27, %s213_s28 }
  0x18   :  { %s278_s21 = sld [smem:[#allocation2 + $0x4]]  ;;  %v168_v8 = vadd.f32 -4.0, %v39_v2  ;;  %v171_v9 = vadd.f32 -5.0, %v39_v2  ;;  %v174_v10 = vadd.f32 -6.0, %v39_v2  ;;  %v177_v11 = vadd.f32 -7.0, %v39_v2  ;;  %p218_p6 = scmp.lt.s32.totalorder %s146_s27, %s146_s27 }
  0x19   :  { %v46_v12 = vmin.f32 %v44_v4, 1.0  ;;  %v56_v13 = vmax.f32 %v159_v5, 0.0  ;;  %v68_v14 = vmax.f32 %v162_v6, 0.0  ;;  %v80_v15 = vmax.f32 %v165_v7, 0.0  ;;  %s280_s22 = sld [smem:[#allocation2 + $0x5]]  ;;  %p219_p7 = scmp.lt.s32.totalorder %s213_s28, %s213_s28 }
  0x1a   :  { %v42_v16 = vstv %s268_s0  ;;  %v92_v17 = vmax.f32 %v168_v8, 0.0  ;;  %v104_v18 = vmax.f32 %v171_v9, 0.0  ;;  %s283_s23 = sld [smem:[#allocation2 + $0x6]]  ;;  %v116_v19 = vmax.f32 %v174_v10, 0.0 }
  0x1b   :  { %v49_v20 = vstv %s270_s19  ;;  %v58_v21 = vmin.f32 %v56_v13, 1.0  ;;  %v70_v22 = vmin.f32 %v68_v14, 1.0  ;;  %v82_v23 = vmin.f32 %v80_v15, 1.0  ;;  %s286_s24 = sld [smem:[#allocation2 + $0x7]]  ;;  %p220_p8 = por %p219_p7, %p218_p6 }
  0x1c   :  { %v50_v24 = vmul.f32 %v49_v20, %v46_v12  ;;  %v61_v25 = vstv %s272_s20  ;;  %v94_v26 = vmin.f32 %v92_v17, 1.0  ;;  %v106_v27 = vmin.f32 %v104_v18, 1.0  ;;  %s289_s25 = sld [smem:[#allocation2 + $0x8]] }
  0x1d   :  { %v62_v28 = vmul.f32 %v61_v25, %v58_v21  ;;  %v73_v29 = vstv %s276_s1  ;;  %v118_v30 = vmin.f32 %v116_v19, 1.0  ;;  %v128_v31 = vmax.f32 %v177_v11, 0.0  ;;  %p221_p9 = pnand %p220_p8, %p214_p5 }
  0x1e   :  { %v52_v32 = vadd.f32 %v50_v24, %v42_v16  ;;  %v74_v33 = vmul.f32 %v73_v29, %v70_v22  ;;  %v85_v34 = vstv %s278_s21  ;;  %v45_v35 = vmax.f32 %v274_v3, 0.0 }
  0x1f   :  { %v86_v36 = vmul.f32 %v85_v34, %v82_v23  ;;  %v97_v37 = vstv %s280_s22  ;;  %v130_v38 = vmin.f32 %v128_v31, 1.0  ;;  %v160_v39 = vadd.f32 -1.0, %v274_v3 }
  0x20   :  { %v64_v40 = vadd.f32 %v62_v28, %v52_v32  ;;  %v98_v41 = vmul.f32 %v97_v37, %v94_v26  ;;  %v109_v42 = vstv %s283_s23  ;;  %v47_v43 = vmin.f32 %v45_v35, 1.0 }
  0x21   :  { %v110_v44 = vmul.f32 %v109_v42, %v106_v27  ;;  %v121_v45 = vstv %s286_s24  ;;  %v57_v46 = vmax.f32 %v160_v39, 0.0  ;;  %v163_v47 = vadd.f32 -2.0, %v274_v3 }
  0x22   :  { %v76_v48 = vadd.f32 %v74_v33, %v64_v40  ;;  %v122_v49 = vmul.f32 %v121_v45, %v118_v30  ;;  %v133_v50 = vstv %s289_s25  ;;  %v51_v51 = vmul.f32 %v49_v20, %v47_v43 }
  0x23   :  { %v134_v52 = vmul.f32 %v133_v50, %v130_v38  ;;  %v59_v53 = vmin.f32 %v57_v46, 1.0  ;;  %v69_v54 = vmax.f32 %v163_v47, 0.0  ;;  %v166_v55 = vadd.f32 -3.0, %v274_v3 }
  0x24   :  { %v88_v56 = vadd.f32 %v86_v36, %v76_v48  ;;  %v53_v57 = vadd.f32 %v51_v51, %v42_v16  ;;  %v169_v58 = vadd.f32 -4.0, %v274_v3  ;;  %v172_v59 = vadd.f32 -5.0, %v274_v3 }
  0x25   :  { %v63_v60 = vmul.f32 %v61_v25, %v59_v53  ;;  %v71_v61 = vmin.f32 %v69_v54, 1.0  ;;  %v81_v62 = vmax.f32 %v166_v55, 0.0  ;;  %v175_v63 = vadd.f32 -6.0, %v274_v3 }
  0x26   :  { %v100_v0 = vadd.f32 %v98_v41, %v88_v56  ;;  %v93_v1 = vmax.f32 %v169_v58, 0.0  ;;  %v105_v2 = vmax.f32 %v172_v59, 0.0  ;;  %v178_v4 = vadd.f32 -7.0, %v274_v3 }
  0x27   :  { %v65_v5 = vadd.f32 %v63_v60, %v53_v57  ;;  %v75_v6 = vmul.f32 %v73_v29, %v71_v61  ;;  %v83_v7 = vmin.f32 %v81_v62, 1.0  ;;  %v117_v8 = vmax.f32 %v175_v63, 0.0 }
  0x28   :  { %v112_v9 = vadd.f32 %v110_v44, %v100_v0  ;;  %v95_v10 = vmin.f32 %v93_v1, 1.0  ;;  %v107_v11 = vmin.f32 %v105_v2, 1.0  ;;  %v129_v12 = vmax.f32 %v178_v4, 0.0 }
  0x29   :  { %v77_v13 = vadd.f32 %v75_v6, %v65_v5  ;;  %v87_v14 = vmul.f32 %v85_v34, %v83_v7  ;;  %v119_v15 = vmin.f32 %v117_v8, 1.0 }
  0x2a   :  { %v124_v16 = vadd.f32 %v122_v49, %v112_v9  ;;  %v99_v17 = vmul.f32 %v97_v37, %v95_v10  ;;  %v111_v19 = vmul.f32 %v109_v42, %v107_v11  ;;  %v131_v20 = vmin.f32 %v129_v12, 1.0 }
  0x2b   :  { %v89_v18 = vadd.f32 %v87_v14, %v77_v13  ;;  %v123_v23 = vmul.f32 %v121_v45, %v119_v15 }
  0x2c   :  { %v136_v21 = vadd.f32 %v134_v52, %v124_v16  ;;  %v135_v24 = vmul.f32 %v133_v50, %v131_v20 }
  0x2d   :  { %v101_v22 = vadd.f32 %v99_v17, %v89_v18 }
  0x2e   :  { %138 = vst [vmem:[#allocation7] sm:$0xff] %v136_v21 }
  0x2f   :  { %v113_v3 = vadd.f32 %v111_v19, %v101_v22 }
  0x31   :  { %v125_v25 = vadd.f32 %v123_v23, %v113_v3 }
  0x33   :  { %v137_v26 = vadd.f32 %v135_v24, %v125_v25 }
  0x35   :  { %139 = vst [vmem:[#allocation7 + $0x8] sm:$0xff] %v137_v26 }
  0x36   :  { %224 = shalt.err (!%p221_p9)
}
  0x37   :  { %151 = dma.vmem_to_hbm [thread:$0]  %s146_s27, 256, %s313_s2, [#allocation4], %s241_s15, %s241_s15, %s242_s16  }
  0x38   :  { %237 = dma.done.wait [#allocation4], 256  }
  0x39   :  { %238 = vsyncadd [#allocation4], 4294967040 }
  0x3a   :  { %155 = vsyncpa [#allocation3], 1 }
  0x3b   :  { %156 = vsyncpa [#allocation4], 1 }
  0x3c   :  { %157 = vsyncpa [#allocation5], 1 }

</bundles_post_ra>
